<compile_context>
chip_gen: v5e
topology: v5e:2x2
jax: 0.10.0
libtpu: 0.0.40
codegen_flags: <defaults>
</compile_context>

<pallas_src>
import functools

import jax
import jax.numpy as jnp
from jax.experimental import pallas as pl
from jax.experimental.pallas import tpu as pltpu

LANES = 128


def _round_up(x, m):
    return ((x + m - 1) // m) * m


def _pick_tile(B, tile_b):
    """Largest batch tile <= tile_b that keeps >= 4 grid steps (so the
    'parallel' batch axis shards across both v7x TensorCores with >= 2
    pipelined steps per core), rounded to 16 rows for bf16 sublane packing."""
    if B <= 4 * 16:
        return _round_up(B, 16)
    t = min(tile_b, _round_up(pl.cdiv(B, 4), 16))
    return max(16, _round_up(t, 16))


def mlp_kernel(x_ref, w1_ref, b1_ref, w2_ref, b2_ref, o_ref):
    # Cast the activation tile to bf16 in-kernel (VPU, hidden under DMA).
    x = x_ref[...].astype(jnp.bfloat16)
    # hidden = relu(x @ W1 + b1)   -- bf16 x bf16 -> f32 accumulate on the MXU
    h = jnp.dot(x, w1_ref[...], preferred_element_type=jnp.float32)
    h = jnp.maximum(h + b1_ref[...], 0.0)
    # logits = hidden @ W2 + b2    -- lane-dense (padded to 128) N dimension
    out = jnp.dot(h.astype(jnp.bfloat16), w2_ref[...],
                  preferred_element_type=jnp.float32)
    # bf16 store halves the padded-output HBM writeback.
    o_ref[...] = (out + b2_ref[...]).astype(o_ref.dtype)


def prepare_params(w1, b1, w2, b2, numclass=10):
    """One-time weight prep (hoisted out of the per-call forward):
    bf16 casts + lane-dense zero-pad of the class dimension (10 -> 128)."""
    hidden = w1.shape[1]
    c_pad = _round_up(numclass, LANES)
    w1b = w1.astype(jnp.bfloat16)
    b1f = b1.astype(jnp.float32).reshape(1, hidden)
    w2p = jnp.zeros((hidden, c_pad), jnp.bfloat16).at[:, :numclass].set(
        w2.astype(jnp.bfloat16))
    b2p = jnp.zeros((1, c_pad), jnp.float32).at[:, :numclass].set(
        b2.astype(jnp.float32))
    return w1b, b1f, w2p, b2p


@functools.partial(jax.jit, static_argnames=("numclass", "tile_b"))
def mlp_forward(x, w1b, b1f, w2p, b2p, *, numclass=10, tile_b=2048):
    """Fused two-layer MLP: fc(relu(linear(x.view(B, -1))))."""
    B = x.shape[0]
    x = x.reshape(B, -1)                    # x.view(B, -1)  (layout no-op)
    d_in = x.shape[1]
    hidden = w1b.shape[1]
    c_pad = w2p.shape[1]

    tile = _pick_tile(B, tile_b)
    grid = (pl.cdiv(B, tile),)              # ragged last tile handled by Pallas

    out = pl.pallas_call(
        mlp_kernel,
        out_shape=jax.ShapeDtypeStruct((B, c_pad), jnp.bfloat16),
        grid_spec=pltpu.PrefetchScalarGridSpec(
            num_scalar_prefetch=0,
            grid=grid,
            in_specs=[
                pl.BlockSpec((tile, d_in), lambda i: (i, 0)),     # x tile (pipelined)
                pl.BlockSpec((d_in, hidden), lambda i: (0, 0)),   # W1 (VMEM-resident)
                pl.BlockSpec((1, hidden), lambda i: (0, 0)),      # b1 (VMEM-resident)
                pl.BlockSpec((hidden, c_pad), lambda i: (0, 0)),  # W2 (VMEM-resident)
                pl.BlockSpec((1, c_pad), lambda i: (0, 0)),       # b2 (VMEM-resident)
            ],
            out_specs=pl.BlockSpec((tile, c_pad), lambda i: (i, 0)),
        ),
        compiler_params=pltpu.CompilerParams(
            dimension_semantics=("parallel",),   # shard batch across v7x TCs
            vmem_limit_bytes=32 * 1024 * 1024,   # headroom for large batch tiles
        ),
        # TODO(synk): if d_in/hidden grow, single-buffer the constant-index
        # weight specs (pipeline_mode=pl.Buffered(1)) and re-derive the v7x
        # VMEM budget; negligible at these sizes.
    )(x, w1b, b1f, w2p, b2p)

    # Strip the lane-padding of the class dim; cast logits back to f32.
    return out[:, :numclass].astype(jnp.float32)


def init_params(key, in_features, hidden_size, numclass):
    """PyTorch-style uniform(-1/sqrt(fan_in), 1/sqrt(fan_in)) init (f32 master)."""
    k1, k2, k3, k4 = jax.random.split(key, 4)
    s1 = 1.0 / jnp.sqrt(in_features)
    s2 = 1.0 / jnp.sqrt(hidden_size)
    w1 = jax.random.uniform(k1, (in_features, hidden_size), jnp.float32, -s1, s1)
    b1 = jax.random.uniform(k2, (hidden_size,), jnp.float32, -s1, s1)
    w2 = jax.random.uniform(k3, (hidden_size, numclass), jnp.float32, -s2, s2)
    b2 = jax.random.uniform(k4, (numclass,), jnp.float32, -s2, s2)
    return w1, b1, w2, b2


if __name__ == "__main__":
    key = jax.random.PRNGKey(0)
    kx, kp = jax.random.split(key)

    batch = 512          # 4 grid steps at the picked tile=128 -> exercises the
                         # batch grid + megacore sharding with pipelining.
    in_features = 64     # e.g. x of shape (B, 1, 8, 8) flattened by view(B, -1)
    hidden_size = 128
    numclass = 10

    x = jax.random.normal(kx, (batch, 1, 8, 8), jnp.float32)
    w1, b1, w2, b2 = init_params(kp, in_features, hidden_size, numclass)

    # One-time (hoisted) weight prep, then the fused forward.
    w1b, b1f, w2p, b2p = prepare_params(w1, b1, w2, b2, numclass=numclass)
    out = mlp_forward(x, w1b, b1f, w2p, b2p, numclass=numclass)
    out = jax.block_until_ready(out)
    assert out.shape == (batch, numclass)

    # Reference with identical numerics (bf16 operands, f32 accumulation,
    # bf16-rounded logits); forward semantics are fc(relu(linear(x.view(B,-1)))).
    xr = x.reshape(batch, -1).astype(jnp.bfloat16)
    h_ref = jnp.maximum(
        jnp.dot(xr, w1.astype(jnp.bfloat16),
                preferred_element_type=jnp.float32) + b1, 0.0)
    ref = (jnp.dot(h_ref.astype(jnp.bfloat16), w2.astype(jnp.bfloat16),
                   preferred_element_type=jnp.float32) + b2)
    ref = ref.astype(jnp.bfloat16).astype(jnp.float32)
    assert jnp.allclose(out, ref, atol=2e-2, rtol=2e-2), (
        float(jnp.max(jnp.abs(out - ref))))

    print("KERNEL_OK")
</pallas_src>

<mosaic_0001>
module attributes {stable_mosaic.version = 11 : i64} {
  func.func @mlp_kernel(%arg0: i32, %arg1: memref<128x64xf32, #tpu.memory_space<vmem>>, %arg2: memref<64x128xbf16, #tpu.memory_space<vmem>>, %arg3: memref<1x128xf32, #tpu.memory_space<vmem>>, %arg4: memref<128x128xbf16, #tpu.memory_space<vmem>>, %arg5: memref<1x128xf32, #tpu.memory_space<vmem>>, %arg6: memref<128x128xbf16, #tpu.memory_space<vmem>>) attributes {dimension_semantics = [#tpu.dimension_semantics<parallel>], iteration_bounds = array<i64: 4>, scalar_prefetch = 0 : i64, scratch_operands = 0 : i64, tpu.core_type = #tpu.core_type<tc>, window_params = [{transform_indices = @transform_0, window_bounds = array<i64: 128, 64>}, {pipeline_mode = #tpu.pipeline_mode<synchronous>, transform_indices = @transform_1, window_bounds = array<i64: 64, 128>}, {pipeline_mode = #tpu.pipeline_mode<synchronous>, transform_indices = @transform_2, window_bounds = array<i64: 1, 128>}, {pipeline_mode = #tpu.pipeline_mode<synchronous>, transform_indices = @transform_3, window_bounds = array<i64: 128, 128>}, {pipeline_mode = #tpu.pipeline_mode<synchronous>, transform_indices = @transform_4, window_bounds = array<i64: 1, 128>}, {transform_indices = @transform_5, window_bounds = array<i64: 128, 128>}]} {
    %c0 = arith.constant 0 : index
    %c0_0 = arith.constant 0 : index
    %0 = vector.load %arg1[%c0, %c0_0] : memref<128x64xf32, #tpu.memory_space<vmem>>, vector<128x64xf32>
    %1 = arith.truncf %0 : vector<128x64xf32> to vector<128x64xbf16>
    %c0_1 = arith.constant 0 : index
    %c0_2 = arith.constant 0 : index
    %2 = vector.load %arg2[%c0_1, %c0_2] : memref<64x128xbf16, #tpu.memory_space<vmem>>, vector<64x128xbf16>
    %cst = arith.constant dense<0.000000e+00> : vector<128x128xf32>
    %3 = tpu.matmul %1, %2, %cst {dimension_numbers = #tpu.dot_dimension_numbers<[1], [0], [0], [1], [0, 0, 1, 1], [], []>} : vector<128x64xbf16>, vector<64x128xbf16>, vector<128x128xf32> -> vector<128x128xf32>
    %c0_3 = arith.constant 0 : index
    %c0_4 = arith.constant 0 : index
    %4 = vector.load %arg3[%c0_3, %c0_4] : memref<1x128xf32, #tpu.memory_space<vmem>>, vector<1x128xf32>
    %5 = vector.broadcast %4 : vector<1x128xf32> to vector<128x128xf32>
    %6 = arith.addf %3, %5 : vector<128x128xf32>
    %cst_5 = arith.constant 0.000000e+00 : f32
    %7 = vector.broadcast %cst_5 : f32 to vector<128x128xf32>
    %8 = arith.maximumf %6, %7 : vector<128x128xf32>
    %9 = arith.truncf %8 : vector<128x128xf32> to vector<128x128xbf16>
    %c0_6 = arith.constant 0 : index
    %c0_7 = arith.constant 0 : index
    %10 = vector.load %arg4[%c0_6, %c0_7] : memref<128x128xbf16, #tpu.memory_space<vmem>>, vector<128x128xbf16>
    %cst_8 = arith.constant dense<0.000000e+00> : vector<128x128xf32>
    %11 = tpu.matmul %9, %10, %cst_8 {dimension_numbers = #tpu.dot_dimension_numbers<[1], [0], [0], [1], [0, 0, 1, 1], [], []>} : vector<128x128xbf16>, vector<128x128xbf16>, vector<128x128xf32> -> vector<128x128xf32>
    %c0_9 = arith.constant 0 : index
    %c0_10 = arith.constant 0 : index
    %12 = vector.load %arg5[%c0_9, %c0_10] : memref<1x128xf32, #tpu.memory_space<vmem>>, vector<1x128xf32>
    %13 = vector.broadcast %12 : vector<1x128xf32> to vector<128x128xf32>
    %14 = arith.addf %11, %13 : vector<128x128xf32>
    %15 = arith.truncf %14 : vector<128x128xf32> to vector<128x128xbf16>
    %c0_11 = arith.constant 0 : index
    %c0_12 = arith.constant 0 : index
    %16 = vector.load %arg6[%c0_11, %c0_12] : memref<128x128xbf16, #tpu.memory_space<vmem>>, vector<128x128xbf16>
    tpu.vector_store %arg6[%c0_11, %c0_12], %15 {strides = array<i32>} : memref<128x128xbf16, #tpu.memory_space<vmem>>, vector<128x128xbf16>,
    return
  }
  func.func @transform_0(%arg0: i32) -> (i32, i32) {
    %c0_i32 = arith.constant 0 : i32
    %c0_i32_0 = arith.constant 0 : i32
    return %arg0, %c0_i32 : i32, i32
  }
  func.func @transform_1(%arg0: i32) -> (i32, i32) {
    %c0_i32 = arith.constant 0 : i32
    %c0_i32_0 = arith.constant 0 : i32
    %c0_i32_1 = arith.constant 0 : i32
    return %c0_i32, %c0_i32_0 : i32, i32
  }
  func.func @transform_2(%arg0: i32) -> (i32, i32) {
    %c0_i32 = arith.constant 0 : i32
    %c0_i32_0 = arith.constant 0 : i32
    %c0_i32_1 = arith.constant 0 : i32
    return %c0_i32, %c0_i32_0 : i32, i32
  }
  func.func @transform_3(%arg0: i32) -> (i32, i32) {
    %c0_i32 = arith.constant 0 : i32
    %c0_i32_0 = arith.constant 0 : i32
    %c0_i32_1 = arith.constant 0 : i32
    return %c0_i32, %c0_i32_0 : i32, i32
  }
  func.func @transform_4(%arg0: i32) -> (i32, i32) {
    %c0_i32 = arith.constant 0 : i32
    %c0_i32_0 = arith.constant 0 : i32
    %c0_i32_1 = arith.constant 0 : i32
    return %c0_i32, %c0_i32_0 : i32, i32
  }
  func.func @transform_5(%arg0: i32) -> (i32, i32) {
    %c0_i32 = arith.constant 0 : i32
    %c0_i32_0 = arith.constant 0 : i32
    return %arg0, %c0_i32 : i32, i32
  }
}

</mosaic_0001>

<bundles_post_ra>
// kernel: mlp_forward.1
= control target key start
LH: loop header
LB: loop body
LE: loop exit
PB: predicated region body
PF: predicated region fallthrough
CT: control target
= control target key end

     0   :  { %s778_s18 = smov 0   ;;  %s877_s0 = inlined_call_operand.vmem [shape: f32[512,64], index: 0, kind: input, shape index: {}]   ;;  %s878_s1 = inlined_call_operand.vmem [shape: bf16[64,128], index: 1, kind: input, shape index: {}]   ;;  %s879_s2 = inlined_call_operand.vmem [shape: f32[1,128], index: 2, kind: input, shape index: {}]   ;;  %s880_s3 = inlined_call_operand.vmem [shape: bf16[128,128], index: 3, kind: input, shape index: {}]   ;;  %s881_s4 = inlined_call_operand.vmem [shape: f32[1,128], index: 4, kind: input, shape index: {}]   ;;  %s882_s5 = inlined_call_operand.vmem [shape: bf16[512,128], index: 5, kind: output, shape index: {}]  }
   0x1 LB: > { %s592_s19 = sadd.s32 4294967295, %s746_s18   ;;  %p596_p0 = scmp.ge.s32.totalorder %s746_s18, 1  ;;  %s746_s18 = sphi %s778_s18, %s15_s18  }
   0x2   : > { %p188_p1 = scmp.lt.s32.totalorder %s746_s18, 5 }
   0x4   : > { %p189_p2 = pnand %p596_p0, %p188_p1 }
   0x5   : > { %s597_s22 = sshll.u32 (!%p189_p2), %s592_s19, 4 }
   0x6   : > { %192 = sbr.rel (%p189_p2) target bundleno = 424 (0x1a8), region = 40  ;;  %p217_p3 = scmp.lt.s32.totalorder (!%p189_p2), %s597_s22, 63 }
   0xb   : > { %v662_v0 = vld [vmem:[%s878_s1 + $0x18] sm:$0xff]  ;;  %v661_v1 = vld [vmem:[%s878_s1 + $0x10] sm:$0xff]  ;;  %s884_s22 = smov (!%p217_p3, %s597_s22), 63  ;;  %v660_v2 = vld [vmem:[%s878_s1 + $0x8] sm:$0xff]  ;;  %vm289_vm0 = vcmask 523264  }
   0xc   : > { %318 = vmatpush.bf16.msra.mxu0 %v662_v0  ;;  %718 = vmatpush.bf16.msra.mxu3 %v662_v0  ;;  %s598_s25 = sshll.u32 %s884_s22, 3  ;;  %v659_v3 = vld [vmem:[%s878_s1] sm:$0xff]  ;;  %v670_v16 = vld [vmem:[%s880_s3 + $0x38] sm:$0xff]  ;;  %v669_v17 = vld [vmem:[%s880_s3 + $0x30] sm:$0xff] }
   0xd   : > { %s801_s30 = scalar_lea.vmem %s877_s0, %s598_s25  ;;  %455 = vmatpush.bf16.msra.mxu1 %v670_v16  ;;  %722 = vmatpush.bf16.msra.mxu2 %v670_v16  ;;  %v668_v18 = vld [vmem:[%s880_s3 + $0x28] sm:$0xff]  ;;  %v667_v24 = vld [vmem:[%s880_s3 + $0x20] sm:$0xff]  ;;  %v666_v32 = vld [vmem:[%s880_s3 + $0x18] sm:$0xff] }
   0xe   : > { %v229_v4 = vld [vmem:[%s801_s30] sm:$0xff]  ;;  %v230_v5 = vld [vmem:[%s801_s30 + $0x8] sm:$0xff]  ;;  %v231_v7 = vld [vmem:[%s801_s30 + $0x10] sm:$0xff] }
   0xf   : > { %v245_v6 = vpack.c.bf16 %v230_v5, %v229_v4  ;;  %v232_v8 = vld [vmem:[%s801_s30 + $0x18] sm:$0xff]  ;;  %v233_v10 = vld [vmem:[%s801_s30 + $0x20] sm:$0xff]  ;;  %v234_v11 = vld [vmem:[%s801_s30 + $0x28] sm:$0xff] }
  0x10   : > { %319 = vmatpush.bf16.msra.mxu0 %v661_v1  ;;  %719 = vmatpush.bf16.msra.mxu3 %v661_v1  ;;  %v246_v9 = vpack.c.bf16 %v232_v8, %v231_v7  ;;  %v247_v12 = vpack.c.bf16 %v234_v11, %v233_v10  ;;  %v239_v13 = vld [vmem:[%s801_s30 + $0x50] sm:$0xff]  ;;  %v240_v14 = vld [vmem:[%s801_s30 + $0x58] sm:$0xff]  ;;  %v241_v21 = vld [vmem:[%s801_s30 + $0x60] sm:$0xff] }
  0x11   : > { %v250_v15 = vpack.c.bf16 %v240_v14, %v239_v13  ;;  %456 = vmatpush.bf16.msra.mxu1 %v669_v17  ;;  %723 = vmatpush.bf16.msra.mxu2 %v669_v17  ;;  %v235_v19 = vld [vmem:[%s801_s30 + $0x30] sm:$0xff]  ;;  %v236_v20 = vld [vmem:[%s801_s30 + $0x38] sm:$0xff]  ;;  %v242_v22 = vld [vmem:[%s801_s30 + $0x68] sm:$0xff] }
  0x12   : > { %v248_v23 = vpack.c.bf16 %v236_v20, %v235_v19  ;;  %v251_v25 = vpack.c.bf16 %v242_v22, %v241_v21  ;;  %v237_v26 = vld [vmem:[%s801_s30 + $0x40] sm:$0xff]  ;;  %v238_v27 = vld [vmem:[%s801_s30 + $0x48] sm:$0xff]  ;;  %v243_v28 = vld [vmem:[%s801_s30 + $0x70] sm:$0xff] }
  0x13   : > { %v244_v29 = vld [vmem:[%s801_s30 + $0x78] sm:$0xff]  ;;  %v249_v30 = vpack.c.bf16 %v238_v27, %v237_v26  ;;  %v665_v33 = vld [vmem:[%s880_s3 + $0x10] sm:$0xff]  ;;  %v664_v34 = vld [vmem:[%s880_s3 + $0x8] sm:$0xff]  ;;  %s600_s30 = sshll.u32 %s884_s22, 2 }
  0x14   : > { %320 = vmatpush.bf16.msra.mxu0 %v660_v2  ;;  %720 = vmatpush.bf16.msra.mxu3 %v660_v2  ;;  %v252_v31 = vpack.c.bf16 %v244_v29, %v243_v28  ;;  %v663_v35 = vld [vmem:[%s880_s3] sm:$0xff]  ;;  %s864_s8 = scalar_lea.vmem %s882_s5, %s600_s30 }
  0x15   : > { %457 = vmatpush.bf16.msra.mxu1 %v668_v18  ;;  %724 = vmatpush.bf16.msra.mxu2 %v668_v18  ;;  %v738_v37 = vld [vmem:[%s879_s2] ss:$0 sm:$0xff] }
  0x18   : > { %321 = vmatpush.bf16.msra.mxu0 %v659_v3  ;;  %721 = vmatpush.bf16.msra.mxu3 %v659_v3 }
  0x19   : > { %458 = vmatpush.bf16.msra.mxu1 %v667_v24  ;;  %725 = vmatpush.bf16.msra.mxu2 %v667_v24 }
  0x1b   : > { %617 = vmatmul.msk.bf16.vlgmr.msra.gmra.mxu0 %vm289_vm0, %v245_v6  ;;  %622 = vmatmul.msk.bf16.vlgmr.msra.gmra.mxu3 %vm289_vm0, %v250_v15 }
  0x1d   : > { %459 = vmatpush.bf16.msra.mxu1 %v666_v32  ;;  %726 = vmatpush.bf16.msra.mxu2 %v666_v32 }
  0x21   : > { %460 = vmatpush.bf16.msra.mxu1 %v665_v33  ;;  %727 = vmatpush.bf16.msra.mxu2 %v665_v33 }
  0x25   : > { %461 = vmatpush.bf16.msra.mxu1 %v664_v34  ;;  %728 = vmatpush.bf16.msra.mxu2 %v664_v34 }
  0x29   : > { %462 = vmatpush.bf16.msra.mxu1 %v663_v35  ;;  %729 = vmatpush.bf16.msra.mxu2 %v663_v35 }
  0x2b   : > { %618 = vmatmul.msk.bf16.gmra.mxu0 %vm289_vm0, %v246_v9  ;;  %623 = vmatmul.msk.bf16.gmra.mxu3 %vm289_vm0, %v251_v25 }
  0x3b   : > { %619 = vmatmul.msk.bf16.gmra.mxu0 %vm289_vm0, %v247_v12  ;;  %624 = vmatmul.msk.bf16.gmra.mxu3 %vm289_vm0, %v252_v31 }
  0x4b   : > { %620 = vmatmul.msk.bf16.gmra.mxu0 %vm289_vm0, %v248_v23 }
  0x5b   : > { %621 = vmatmul.msk.bf16.gmra.mxu0 %vm289_vm0, %v249_v30  ;;  %v739_v30 = vld [vmem:[%s881_s4] ss:$0 sm:$0xff] }
  0x98   : > { %v323_v36 = vpop.f32.mrf.mxu0 }
  0x99   : > { %v324_v38 = vadd.f32 %v738_v37, %v323_v36 }
  0x9b   : > { %v363_v41 = vmax.f32 %v324_v38, 0.0 }
  0x9e   : > { %v348_v2 = vpop.f32.mrf.mxu3 }
  0x9f   : > { %v349_v11 = vadd.f32 %v738_v37, %v348_v2 }
  0xa0   : > { %v325_v39 = vpop.f32.mrf.mxu0 }
  0xa1   : > { %v326_v40 = vadd.f32 %v738_v37, %v325_v39  ;;  %v373_v13 = vmax.f32 %v349_v11, 0.0 }
  0xa3   : > { %v364_v42 = vmax.f32 %v326_v40, 0.0 }
  0xa5   : > { %v379_v43 = vpack.c.bf16 %v364_v42, %v363_v41 }
  0xa6   : > { %v350_v6 = vpop.f32.mrf.mxu3 }
  0xa7   : > { %463 = vmatmul.bf16.vlgmr.msra.gmra.mxu1 %v379_v43  ;;  %v351_v12 = vadd.f32 %v738_v37, %v350_v6 }
  0xa8   : > { %v328_v44 = vpop.f32.mrf.mxu0 }
  0xa9   : > { %v329_v45 = vadd.f32 %v738_v37, %v328_v44  ;;  %v374_v14 = vmax.f32 %v351_v12, 0.0 }
  0xab   : > { %v365_v48 = vmax.f32 %v329_v45, 0.0  ;;  %v384_v15 = vpack.c.bf16 %v374_v14, %v373_v13 }
  0xae   : > { %v353_v10 = vpop.f32.mrf.mxu3 }
  0xaf   : > { %v354_v17 = vadd.f32 %v738_v37, %v353_v10 }
  0xb0   : > { %v330_v46 = vpop.f32.mrf.mxu0 }
  0xb1   : > { %v331_v47 = vadd.f32 %v738_v37, %v330_v46  ;;  %v375_v20 = vmax.f32 %v354_v17, 0.0 }
  0xb3   : > { %v366_v49 = vmax.f32 %v331_v47, 0.0 }
  0xb5   : > { %v380_v50 = vpack.c.bf16 %v366_v49, %v365_v48 }
  0xb6   : > { %v355_v16 = vpop.f32.mrf.mxu3 }
  0xb7   : > { %468 = vmatmul.bf16.gmra.mxu1 %v380_v50  ;;  %v356_v18 = vadd.f32 %v738_v37, %v355_v16 }
  0xb8   : > { %v333_v51 = vpop.f32.mrf.mxu0 }
  0xb9   : > { %v334_v52 = vadd.f32 %v738_v37, %v333_v51  ;;  %v376_v21 = vmax.f32 %v356_v18, 0.0 }
  0xbb   : > { %v367_v55 = vmax.f32 %v334_v52, 0.0  ;;  %v385_v22 = vpack.c.bf16 %v376_v21, %v375_v20 }
  0xbe   : > { %v358_v19 = vpop.f32.mrf.mxu3 }
  0xbf   : > { %v359_v24 = vadd.f32 %v738_v37, %v358_v19 }
  0xc0   : > { %v335_v53 = vpop.f32.mrf.mxu0 }
  0xc1   : > { %v336_v54 = vadd.f32 %v738_v37, %v335_v53  ;;  %v377_v26 = vmax.f32 %v359_v24, 0.0 }
  0xc3   : > { %v368_v56 = vmax.f32 %v336_v54, 0.0 }
  0xc5   : > { %v381_v57 = vpack.c.bf16 %v368_v56, %v367_v55 }
  0xc6   : > { %v360_v23 = vpop.f32.mrf.mxu3 }
  0xc7   : > { %473 = vmatmul.bf16.gmra.mxu1 %v381_v57  ;;  %v361_v25 = vadd.f32 %v738_v37, %v360_v23 }
  0xc8   : > { %v338_v58 = vpop.f32.mrf.mxu0 }
  0xc9   : > { %v339_v59 = vadd.f32 %v738_v37, %v338_v58  ;;  %v378_v27 = vmax.f32 %v361_v25, 0.0 }
  0xcb   : > { %v369_v62 = vmax.f32 %v339_v59, 0.0  ;;  %v386_v28 = vpack.c.bf16 %v378_v27, %v377_v26 }
  0xd0   : > { %v340_v60 = vpop.f32.mrf.mxu0 }
  0xd1   : > { %v341_v61 = vadd.f32 %v738_v37, %v340_v60 }
  0xd3   : > { %v370_v63 = vmax.f32 %v341_v61, 0.0 }
  0xd5   : > { %v382_v0 = vpack.c.bf16 %v370_v63, %v369_v62 }
  0xd7   : > { %478 = vmatmul.bf16.gmra.mxu1 %v382_v0 }
  0xd8   : > { %v343_v1 = vpop.f32.mrf.mxu0 }
  0xd9   : > { %v344_v3 = vadd.f32 %v738_v37, %v343_v1 }
  0xdb   : > { %v371_v7 = vmax.f32 %v344_v3, 0.0 }
  0xe0   : > { %v345_v4 = vpop.f32.mrf.mxu0 }
  0xe1   : > { %v346_v5 = vadd.f32 %v738_v37, %v345_v4 }
  0xe3   : > { %v372_v8 = vmax.f32 %v346_v5, 0.0 }
  0xe5   : > { %v383_v9 = vpack.c.bf16 %v372_v8, %v371_v7 }
  0xe7   : > { %483 = vmatmul.bf16.vlgmr.msra.gmra.mxu2 %v383_v9 }
  0xf7   : > { %488 = vmatmul.bf16.gmra.mxu2 %v384_v15 }
 0x107   : > { %493 = vmatmul.bf16.gmra.mxu2 %v385_v22 }
 0x117   : > { %498 = vmatmul.bf16.gmra.mxu2 %v386_v28 }
 0x124   : > { %v464_v29 = vpop.f32.mrf.mxu1 }
 0x125   : > { %v465_v32 = vadd.f32 %v739_v30, %v464_v29 }
 0x12c   : > { %v466_v31 = vpop.f32.mrf.mxu1 }
 0x12d   : > { %v467_v33 = vadd.f32 %v739_v30, %v466_v31 }
 0x12f   : > { %v674_v34 = vpack.c.bf16 %v467_v33, %v465_v32 }
 0x131   : > { %675 = vst [vmem:[%s864_s8] sm:$0xff] %v674_v34  }
 0x134   : > { %v469_v35 = vpop.f32.mrf.mxu1 }
 0x135   : > { %v470_v37 = vadd.f32 %v739_v30, %v469_v35 }
 0x13c   : > { %v471_v36 = vpop.f32.mrf.mxu1 }
 0x13d   : > { %v472_v38 = vadd.f32 %v739_v30, %v471_v36 }
 0x13f   : > { %v679_v39 = vpack.c.bf16 %v472_v38, %v470_v37 }
 0x141   : > { %711 = vst [vmem:[%s864_s8 + $0x8] sm:$0xff] %v679_v39  }
 0x144   : > { %v474_v40 = vpop.f32.mrf.mxu1 }
 0x145   : > { %v475_v42 = vadd.f32 %v739_v30, %v474_v40 }
 0x14c   : > { %v476_v41 = vpop.f32.mrf.mxu1 }
 0x14d   : > { %v477_v43 = vadd.f32 %v739_v30, %v476_v41 }
 0x14f   : > { %v684_v44 = vpack.c.bf16 %v477_v43, %v475_v42 }
 0x151   : > { %712 = vst [vmem:[%s864_s8 + $0x10] sm:$0xff] %v684_v44  }
 0x154   : > { %v479_v45 = vpop.f32.mrf.mxu1 }
 0x155   : > { %v480_v47 = vadd.f32 %v739_v30, %v479_v45 }
 0x15c   : > { %v481_v46 = vpop.f32.mrf.mxu1 }
 0x15d   : > { %v482_v48 = vadd.f32 %v739_v30, %v481_v46 }
 0x15f   : > { %v689_v49 = vpack.c.bf16 %v482_v48, %v480_v47 }
 0x161   : > { %713 = vst [vmem:[%s864_s8 + $0x18] sm:$0xff] %v689_v49  }
 0x16a   : > { %v484_v50 = vpop.f32.mrf.mxu2 }
 0x16b   : > { %v485_v52 = vadd.f32 %v739_v30, %v484_v50 }
 0x172   : > { %v486_v51 = vpop.f32.mrf.mxu2 }
 0x173   : > { %v487_v53 = vadd.f32 %v739_v30, %v486_v51 }
 0x175   : > { %v694_v54 = vpack.c.bf16 %v487_v53, %v485_v52 }
 0x177   : > { %714 = vst [vmem:[%s864_s8 + $0x20] sm:$0xff] %v694_v54  }
 0x17a   : > { %v489_v55 = vpop.f32.mrf.mxu2 }
 0x17b   : > { %v490_v57 = vadd.f32 %v739_v30, %v489_v55 }
 0x182   : > { %v491_v56 = vpop.f32.mrf.mxu2 }
 0x183   : > { %v492_v58 = vadd.f32 %v739_v30, %v491_v56 }
 0x185   : > { %v699_v59 = vpack.c.bf16 %v492_v58, %v490_v57 }
 0x187   : > { %715 = vst [vmem:[%s864_s8 + $0x28] sm:$0xff] %v699_v59  }
 0x18a   : > { %v494_v60 = vpop.f32.mrf.mxu2 }
 0x18b   : > { %v495_v62 = vadd.f32 %v739_v30, %v494_v60 }
 0x192   : > { %v496_v61 = vpop.f32.mrf.mxu2 }
 0x193   : > { %v497_v63 = vadd.f32 %v739_v30, %v496_v61 }
 0x195   : > { %v704_v0 = vpack.c.bf16 %v497_v63, %v495_v62 }
 0x197   : > { %716 = vst [vmem:[%s864_s8 + $0x30] sm:$0xff] %v704_v0  }
 0x19a   : > { %v499_v1 = vpop.f32.mrf.mxu2 }
 0x19b   : > { %v500_v3 = vadd.f32 %v739_v30, %v499_v1 }
 0x1a2   : > { %v501_v2 = vpop.f32.mrf.mxu2 }
 0x1a3   : > { %v502_v4 = vadd.f32 %v739_v30, %v501_v2 }
 0x1a5   : > { %v709_v5 = vpack.c.bf16 %v502_v4, %v500_v3 }
 0x1a7   : > { %717 = vst [vmem:[%s864_s8 + $0x38] sm:$0xff] %v709_v5  }
 0x1a8 PF: > { %s15_s18 = sadd.s32 1, %s746_s18  }
 0x1a9   : > { %p12_p4 = scmp.ge.s32.totalorder %s15_s18, 6  }
 0x1ab   :  { %14 = sbr.rel (!%p12_p4) target bundleno = 1 (0x1), region = 70 }

</bundles_post_ra>
